<compile_context>
chip_gen: v7x
topology: tpu7x:2x2x1
jax: 0.10.0
libtpu: 0.0.40
codegen_flags: <defaults>
</compile_context>

<pallas_src>
import jax
import jax.numpy as jnp
from jax.experimental import pallas as pl
from jax.experimental.pallas import tpu as pltpu


def _channel_gate_kernel(x_ref, w1_ref, b1_ref, w2_ref, b2_ref, o_ref):
    # x_ref: (1, C, HW)   w1: (hid, C)  b1: (hid, 1)  w2: (C, hid)  b2: (C, 1)
    x = x_ref[0]                                          # (C, HW)

    # Global average / max pooling over the spatial (lane) axis.
    avg = jnp.mean(x, axis=-1, keepdims=True)             # (C, 1)
    mx = jnp.max(x, axis=-1, keepdims=True)               # (C, 1)

    def mlp(p):                                           # p: (C, 1)
        h = jnp.dot(w1_ref[...], p,
                    preferred_element_type=jnp.float32,
                    precision=jax.lax.Precision.HIGHEST) + b1_ref[...]
        h = jnp.maximum(h, 0.0)                           # ReLU, (hid, 1)
        return jnp.dot(w2_ref[...], h,
                       preferred_element_type=jnp.float32,
                       precision=jax.lax.Precision.HIGHEST) + b2_ref[...]  # (C, 1)

    att = mlp(avg) + mlp(mx)                              # (C, 1)
    gate = jax.nn.sigmoid(att)                            # (C, 1)

    # Broadcast per-channel gate across the lane axis; full-width store.
    o_ref[0] = (x * gate).astype(o_ref.dtype)


@jax.jit
def channel_gate_forward(x, w1, b1, w2, b2):
    """x: (N, C, H, W) f32.  w1: (hid, C), b1: (hid,), w2: (C, hid), b2: (C,).
    Returns (N, C, H, W) = x * sigmoid(MLP(avgpool(x)) + MLP(maxpool(x)))."""
    N, C, H, W = x.shape
    HW = H * W
    hid = w1.shape[0]

    xf = x.reshape(N, C, HW)                              # pure reshape, no copy
    b1c = b1.reshape(hid, 1).astype(jnp.float32)
    b2c = b2.reshape(C, 1).astype(jnp.float32)

    out = pl.pallas_call(
        _channel_gate_kernel,
        out_shape=jax.ShapeDtypeStruct((N, C, HW), x.dtype),
        grid_spec=pltpu.PrefetchScalarGridSpec(
            num_scalar_prefetch=0,
            grid=(N,),
            in_specs=[
                pl.BlockSpec((1, C, HW), lambda n: (n, 0, 0)),   # one sample / step
                pl.BlockSpec((hid, C), lambda n: (0, 0)),        # MLP weights (invariant)
                pl.BlockSpec((hid, 1), lambda n: (0, 0)),
                pl.BlockSpec((C, hid), lambda n: (0, 0)),
                pl.BlockSpec((C, 1), lambda n: (0, 0)),
            ],
            out_specs=pl.BlockSpec((1, C, HW), lambda n: (n, 0, 0)),
        ),
        compiler_params=pltpu.CompilerParams(
            dimension_semantics=("parallel",)),
    )(xf, w1.astype(jnp.float32), b1c, w2.astype(jnp.float32), b2c)

    return out.reshape(N, C, H, W)


if __name__ == "__main__":
    key = jax.random.PRNGKey(0)
    kx, k1, k2, k3, k4 = jax.random.split(key, 5)

    # Small shapes: ChannelGate(gate_channels=32, reduction_ratio=16) on (2, 32, 16, 16).
    N, C, H, W = 2, 32, 16, 16
    reduction_ratio = 16
    hid = C // reduction_ratio                            # 2

    x = jax.random.normal(kx, (N, C, H, W), dtype=jnp.float32)

    # Deterministic synthetic Linear params (PyTorch-style uniform init ranges).
    lim1 = 1.0 / (C ** 0.5)
    w1 = jax.random.uniform(k1, (hid, C), jnp.float32, -lim1, lim1)   # Linear(C, hid).weight
    b1 = jax.random.uniform(k2, (hid,), jnp.float32, -lim1, lim1)
    lim2 = 1.0 / (hid ** 0.5)
    w2 = jax.random.uniform(k3, (C, hid), jnp.float32, -lim2, lim2)   # Linear(hid, C).weight
    b2 = jax.random.uniform(k4, (C,), jnp.float32, -lim2, lim2)

    y = channel_gate_forward(x, w1, b1, w2, b2)
    y = jax.block_until_ready(y)

    # Pure-JAX reference (same math, high-precision matmuls).
    avg = jnp.mean(x, axis=(2, 3))                        # (N, C)
    mx = jnp.max(x, axis=(2, 3))                          # (N, C)

    def ref_mlp(p):
        h = jnp.maximum(
            jnp.einsum("nc,hc->nh", p, w1, precision="highest") + b1, 0.0)
        return jnp.einsum("nh,ch->nc", h, w2, precision="highest") + b2

    att = ref_mlp(avg) + ref_mlp(mx)
    ref = x * jax.nn.sigmoid(att)[:, :, None, None]

    assert y.shape == x.shape
    assert jnp.allclose(y, ref, atol=1e-4, rtol=1e-4)

    print("KERNEL_OK")
</pallas_src>

<mosaic_0001>
module attributes {stable_mosaic.version = 11 : i64} {
  func.func @_channel_gate_kernel(%arg0: i32, %arg1: memref<1x32x256xf32, #tpu.memory_space<vmem>>, %arg2: memref<2x32xf32, #tpu.memory_space<vmem>>, %arg3: memref<2x1xf32, #tpu.memory_space<vmem>>, %arg4: memref<32x2xf32, #tpu.memory_space<vmem>>, %arg5: memref<32x1xf32, #tpu.memory_space<vmem>>, %arg6: memref<1x32x256xf32, #tpu.memory_space<vmem>>) attributes {dimension_semantics = [#tpu.dimension_semantics<parallel>], iteration_bounds = array<i64: 2>, scalar_prefetch = 0 : i64, scratch_operands = 0 : i64, tpu.core_type = #tpu.core_type<tc>, window_params = [{transform_indices = @transform_0, window_bounds = array<i64: 1, 32, 256>}, {pipeline_mode = #tpu.pipeline_mode<synchronous>, transform_indices = @transform_1, window_bounds = array<i64: 2, 32>}, {pipeline_mode = #tpu.pipeline_mode<synchronous>, transform_indices = @transform_2, window_bounds = array<i64: 2, 1>}, {pipeline_mode = #tpu.pipeline_mode<synchronous>, transform_indices = @transform_3, window_bounds = array<i64: 32, 2>}, {pipeline_mode = #tpu.pipeline_mode<synchronous>, transform_indices = @transform_4, window_bounds = array<i64: 32, 1>}, {transform_indices = @transform_5, window_bounds = array<i64: 1, 32, 256>}]} {
    %c0 = arith.constant 0 : index
    %c0_0 = arith.constant 0 : index
    %c0_1 = arith.constant 0 : index
    %0 = vector.load %arg1[%c0, %c0_0, %c0_1] : memref<1x32x256xf32, #tpu.memory_space<vmem>>, vector<1x32x256xf32>
    %1 = vector.shape_cast %0 : vector<1x32x256xf32> to vector<32x256xf32>
    %cst = arith.constant dense<0.000000e+00> : vector<32xf32>
    %2 = vector.multi_reduction <add>, %1, %cst [1] : vector<32x256xf32> to vector<32xf32>
    %3 = vector.shape_cast %2 : vector<32xf32> to vector<32x1xf32>
    %cst_2 = arith.constant 2.560000e+02 : f32
    %4 = vector.broadcast %cst_2 : f32 to vector<32x1xf32>
    %5 = arith.divf %3, %4 : vector<32x1xf32>
    %cst_3 = arith.constant dense<0xFF800000> : vector<32xf32>
    %6 = vector.multi_reduction <maximumf>, %1, %cst_3 [1] : vector<32x256xf32> to vector<32xf32>
    %7 = vector.shape_cast %6 : vector<32xf32> to vector<32x1xf32>
    %c0_4 = arith.constant 0 : index
    %c0_5 = arith.constant 0 : index
    %8 = vector.load %arg2[%c0_4, %c0_5] : memref<2x32xf32, #tpu.memory_space<vmem>>, vector<2x32xf32>
    %cst_6 = arith.constant dense<0.000000e+00> : vector<2x1xf32>
    %9 = tpu.matmul %8, %5, %cst_6 {dimension_numbers = #tpu.dot_dimension_numbers<[1], [0], [0], [1], [0, 0, 1, 1], [], []>, precision = #tpu.contract_precision<fp32>} : vector<2x32xf32>, vector<32x1xf32>, vector<2x1xf32> -> vector<2x1xf32>
    %c0_7 = arith.constant 0 : index
    %c0_8 = arith.constant 0 : index
    %10 = vector.load %arg3[%c0_7, %c0_8] : memref<2x1xf32, #tpu.memory_space<vmem>>, vector<2x1xf32>
    %11 = arith.addf %9, %10 : vector<2x1xf32>
    %cst_9 = arith.constant 0.000000e+00 : f32
    %12 = vector.broadcast %cst_9 : f32 to vector<2x1xf32>
    %13 = arith.maximumf %11, %12 : vector<2x1xf32>
    %c0_10 = arith.constant 0 : index
    %c0_11 = arith.constant 0 : index
    %14 = vector.load %arg4[%c0_10, %c0_11] : memref<32x2xf32, #tpu.memory_space<vmem>>, vector<32x2xf32>
    %cst_12 = arith.constant dense<0.000000e+00> : vector<32x1xf32>
    %15 = tpu.matmul %14, %13, %cst_12 {dimension_numbers = #tpu.dot_dimension_numbers<[1], [0], [0], [1], [0, 0, 1, 1], [], []>, precision = #tpu.contract_precision<fp32>} : vector<32x2xf32>, vector<2x1xf32>, vector<32x1xf32> -> vector<32x1xf32>
    %c0_13 = arith.constant 0 : index
    %c0_14 = arith.constant 0 : index
    %16 = vector.load %arg5[%c0_13, %c0_14] : memref<32x1xf32, #tpu.memory_space<vmem>>, vector<32x1xf32>
    %17 = arith.addf %15, %16 : vector<32x1xf32>
    %c0_15 = arith.constant 0 : index
    %c0_16 = arith.constant 0 : index
    %18 = vector.load %arg2[%c0_15, %c0_16] : memref<2x32xf32, #tpu.memory_space<vmem>>, vector<2x32xf32>
    %cst_17 = arith.constant dense<0.000000e+00> : vector<2x1xf32>
    %19 = tpu.matmul %18, %7, %cst_17 {dimension_numbers = #tpu.dot_dimension_numbers<[1], [0], [0], [1], [0, 0, 1, 1], [], []>, precision = #tpu.contract_precision<fp32>} : vector<2x32xf32>, vector<32x1xf32>, vector<2x1xf32> -> vector<2x1xf32>
    %c0_18 = arith.constant 0 : index
    %c0_19 = arith.constant 0 : index
    %20 = vector.load %arg3[%c0_18, %c0_19] : memref<2x1xf32, #tpu.memory_space<vmem>>, vector<2x1xf32>
    %21 = arith.addf %19, %20 : vector<2x1xf32>
    %cst_20 = arith.constant 0.000000e+00 : f32
    %22 = vector.broadcast %cst_20 : f32 to vector<2x1xf32>
    %23 = arith.maximumf %21, %22 : vector<2x1xf32>
    %c0_21 = arith.constant 0 : index
    %c0_22 = arith.constant 0 : index
    %24 = vector.load %arg4[%c0_21, %c0_22] : memref<32x2xf32, #tpu.memory_space<vmem>>, vector<32x2xf32>
    %cst_23 = arith.constant dense<0.000000e+00> : vector<32x1xf32>
    %25 = tpu.matmul %24, %23, %cst_23 {dimension_numbers = #tpu.dot_dimension_numbers<[1], [0], [0], [1], [0, 0, 1, 1], [], []>, precision = #tpu.contract_precision<fp32>} : vector<32x2xf32>, vector<2x1xf32>, vector<32x1xf32> -> vector<32x1xf32>
    %c0_24 = arith.constant 0 : index
    %c0_25 = arith.constant 0 : index
    %26 = vector.load %arg5[%c0_24, %c0_25] : memref<32x1xf32, #tpu.memory_space<vmem>>, vector<32x1xf32>
    %27 = arith.addf %25, %26 : vector<32x1xf32>
    %28 = arith.addf %17, %27 : vector<32x1xf32>
    %29 = arith.negf %28 : vector<32x1xf32>
    %30 = math.exp %29 : vector<32x1xf32>
    %cst_26 = arith.constant 1.000000e+00 : f32
    %31 = vector.broadcast %cst_26 : f32 to vector<32x1xf32>
    %32 = arith.addf %31, %30 : vector<32x1xf32>
    %33 = arith.divf %31, %32 : vector<32x1xf32>
    %34 = vector.broadcast %33 : vector<32x1xf32> to vector<32x256xf32>
    %35 = arith.mulf %1, %34 : vector<32x256xf32>
    %c0_27 = arith.constant 0 : index
    %c0_28 = arith.constant 0 : index
    %c0_29 = arith.constant 0 : index
    %36 = vector.load %arg6[%c0_27, %c0_28, %c0_29] : memref<1x32x256xf32, #tpu.memory_space<vmem>>, vector<1x32x256xf32>
    %37 = vector.shape_cast %36 : vector<1x32x256xf32> to vector<32x256xf32>
    %38 = vector.shape_cast %35 : vector<32x256xf32> to vector<1x32x256xf32>
    tpu.vector_store %arg6[%c0_27, %c0_28, %c0_29], %38 {strides = array<i32>} : memref<1x32x256xf32, #tpu.memory_space<vmem>>, vector<1x32x256xf32>,
    return
  }
  func.func @transform_0(%arg0: i32) -> (i32, i32, i32) {
    %c0_i32 = arith.constant 0 : i32
    %c0_i32_0 = arith.constant 0 : i32
    %c0_i32_1 = arith.constant 0 : i32
    return %arg0, %c0_i32, %c0_i32_0 : i32, i32, i32
  }
  func.func @transform_1(%arg0: i32) -> (i32, i32) {
    %c0_i32 = arith.constant 0 : i32
    %c0_i32_0 = arith.constant 0 : i32
    %c0_i32_1 = arith.constant 0 : i32
    return %c0_i32, %c0_i32_0 : i32, i32
  }
  func.func @transform_2(%arg0: i32) -> (i32, i32) {
    %c0_i32 = arith.constant 0 : i32
    %c0_i32_0 = arith.constant 0 : i32
    %c0_i32_1 = arith.constant 0 : i32
    return %c0_i32, %c0_i32_0 : i32, i32
  }
  func.func @transform_3(%arg0: i32) -> (i32, i32) {
    %c0_i32 = arith.constant 0 : i32
    %c0_i32_0 = arith.constant 0 : i32
    %c0_i32_1 = arith.constant 0 : i32
    return %c0_i32, %c0_i32_0 : i32, i32
  }
  func.func @transform_4(%arg0: i32) -> (i32, i32) {
    %c0_i32 = arith.constant 0 : i32
    %c0_i32_0 = arith.constant 0 : i32
    %c0_i32_1 = arith.constant 0 : i32
    return %c0_i32, %c0_i32_0 : i32, i32
  }
  func.func @transform_5(%arg0: i32) -> (i32, i32, i32) {
    %c0_i32 = arith.constant 0 : i32
    %c0_i32_0 = arith.constant 0 : i32
    %c0_i32_1 = arith.constant 0 : i32
    return %arg0, %c0_i32, %c0_i32_0 : i32, i32, i32
  }
}

</mosaic_0001>

<bundles_post_ra>
// kernel: channel_gate_forward.1
= control target key start
LH: loop header
LB: loop body
LE: loop exit
PB: predicated region body
PF: predicated region fallthrough
CT: control target
= control target key end

     0   :  { %s3119_s18 = smov 0   ;;  %s3465_s0 = inlined_call_operand.vmem [shape: f32[2,32,256], index: 0, kind: input, shape index: {}]   ;;  %s3466_s1 = inlined_call_operand.vmem [shape: f32[2,32], index: 1, kind: input, shape index: {}]   ;;  %s3467_s2 = inlined_call_operand.vmem [shape: f32[2,1], index: 2, kind: input, shape index: {}]   ;;  %s3468_s3 = inlined_call_operand.vmem [shape: f32[32,2], index: 3, kind: input, shape index: {}]   ;;  %s3469_s4 = inlined_call_operand.vmem [shape: f32[32,1], index: 4, kind: input, shape index: {}]   ;;  %s3470_s5 = inlined_call_operand.vmem [shape: f32[2,32,256], index: 5, kind: output, shape index: {}]  }
   0x1 LB: > { %s2537_s19 = sadd.s32 4294967295, %s3083_s18   ;;  %p2541_p0 = scmp.ge.s32.totalorder %s3083_s18, 1  ;;  %s3083_s18 = sphi %s3119_s18, %s15_s18  }
   0x2   : > { %p187_p1 = scmp.lt.s32.totalorder %s3083_s18, 3 }
   0x4   : > { %p188_p2 = pnand %p2541_p0, %p187_p1 }
   0x5   : > { %p215_p3 = scmp.lt.s32.totalorder (!%p188_p2), %s2537_s19, 1  ;;  %v3085_v12 = vmov (!%p188_p2), 0.0|0.0   ;;  %vm3086_vm0 = vmmov (!%p188_p2), 0   ;;  %v3087_v13 = vmov (!%p188_p2), 0.0   ;;  %v262_v18 = vld [vmem:[%s3466_s1] sm:$0x3] (!%p188_p2) }
   0x6   : > { %191 = sbr.rel (%p188_p2) target bundleno = 1123 (0x463), region = 40  ;;  %2902 = vmatprep.subr.bf16.mxu0 (!%p188_p2), %v3085_v12  ;;  %2682 = vmatprep.mubr.msk.f32.mxu0 (!%p188_p2), %vm3086_vm0, %v3087_v13  ;;  %vm264_vm1 = vcmask (!%p188_p2), 261120   ;;  %v754_v61 = vld [vmem:[%s3468_s3] sm:$0xff] (!%p188_p2)  ;;  %vm762_vm2 = vcmask (!%p188_p2), 15360   ;;  %vm775_vm3 = vcmask (!%p188_p2), 1041408  }
   0x7   : > { %v266_v19 = vsel (!%p188_p2), %vm264_vm1, %v262_v18, 0  ;;  %v764_v62 = vsel (!%p188_p2), %vm762_vm2, %v754_v61, 0 }
   0x8   : > { %v3173_v20 = vand.u32 (!%p188_p2), 4294901760, %v266_v19  ;;  %v3216_v63 = vand.u32 (!%p188_p2), 4294901760, %v764_v62 }
   0xa   : > { %v3176_v25 = vsub.f32 (!%p188_p2), %v266_v19, %v3173_v20  ;;  %2782 = vmatprep.mubr.f32.mxu1 (!%p188_p2), %v3216_v63 }
   0xc   : > { %v3179_v34 = vand.u32 (!%p188_p2), 4294901760, %v3176_v25 }
   0xd   : > { %s3472_s19 = smov (!%p215_p3, %s2537_s19), 1 }
   0xe   : > { %s2552_s20 = sshll.u32 %s3472_s19, 6  ;;  %v340_v42 = vsub.f32 %v3176_v25, %v3179_v34 }
   0xf   : > { %s219_s23 = scalar_lea.vmem %s3465_s0, %s2552_s20  ;;  %s224_s24 = scalar_lea.vmem %s3470_s5, %s2552_s20 }
  0x10   : > { %v3135_v0 = vld [vmem:[%s219_s23 + $0x20] sm:$0xff]  ;;  %v3137_v1 = vld [vmem:[%s219_s23 + $0x28] sm:$0xff]  ;;  %v3145_v5 = vld [vmem:[%s219_s23 + $0x30] sm:$0xff]  ;;  %v3184_v49 = vand.u32 4294901760, %v340_v42 }
  0x11   : > { %v3139_v2 = vld [vmem:[%s219_s23] sm:$0xff]  ;;  %v239_v3 = vadd.f32 %v3137_v1, %v3135_v0  ;;  %v3143_v4 = vld [vmem:[%s219_s23 + $0x8] sm:$0xff]  ;;  %v3147_v6 = vld [vmem:[%s219_s23 + $0x38] sm:$0xff]  ;;  %v256_v17 = vmax.f32 %v3135_v0, %v3137_v1 }
  0x12   : > { %v233_v7 = vadd.f32 %v3143_v4, %v3139_v2  ;;  %v3151_v8 = vld [vmem:[%s219_s23 + $0x10] sm:$0xff]  ;;  %v3153_v9 = vld [vmem:[%s219_s23 + $0x18] sm:$0xff]  ;;  %v242_v10 = vadd.f32 %v3147_v6, %v3145_v5  ;;  %v250_v15 = vmax.f32 %v3139_v2, %v3143_v4  ;;  %v259_v16 = vmax.f32 %v3145_v5, %v3147_v6 }
  0x13   : > { %240 = vadd.xlane.f32.xlu1 %v239_v3  ;;  %v236_v11 = vadd.f32 %v3153_v9, %v3151_v8  ;;  %v253_v14 = vmax.f32 %v3151_v8, %v3153_v9  ;;  %v3219_v3 = vsub.f32 %v764_v62, %v3216_v63 }
  0x14   : > { %234 = vadd.xlane.f32.xlu0 %v233_v7 }
  0x15   : > { %v3223_v7 = vand.u32 4294901760, %v3219_v3 }
  0x17   : > { %243 = vadd.xlane.f32.xlu1 %v242_v10  ;;  %v848_v10 = vsub.f32 %v3219_v3, %v3223_v7 }
  0x18   : > { %237 = vadd.xlane.f32.xlu0 %v236_v11 }
  0x19   : > { %v3227_v11 = vand.u32 4294901760, %v848_v10 }
  0x1b   : > { %254 = vmax.xlane.f32.xlu1 %v253_v14 }
  0x1c   : > { %251 = vmax.xlane.f32.xlu0 %v250_v15  ;;  %v755_v15 = vld [vmem:[%s3468_s3 + $0x8] sm:$0xff] }
  0x1d   : > { %v767_v18 = vsel %vm762_vm2, %v755_v15, 0 }
  0x1f   : > { %260 = vmax.xlane.f32.xlu1 %v259_v16 }
  0x20   : > { %257 = vmax.xlane.f32.xlu0 %v256_v17  ;;  %v756_v17 = vld [vmem:[%s3468_s3 + $0x10] sm:$0xff] }
  0x21   : > { %v770_v19 = vsel %vm762_vm2, %v756_v17, 0 }
  0xa0   : > { %v241_v21 = vpop.xlane.xlu1 %240 }
  0xa1   : > { %v248_v22 = vmul.f32 0.00390625, %v241_v21  ;;  %v235_v23 = vpop.xlane.xlu0 %234  ;;  %v757_v21 = vld [vmem:[%s3468_s3 + $0x18] sm:$0xff] }
  0xa2   : > { %v246_v24 = vmul.f32 0.00390625, %v235_v23 }
  0xa3   : > { %v275_v26 = vand.u32 4294901760, %v248_v22 }
  0xa4   : > { %v269_v27 = vand.u32 4294901760, %v246_v24  ;;  %v244_v28 = vpop.xlane.xlu1 %243 }
  0xa5   : > { %v249_v29 = vmul.f32 0.00390625, %v244_v28  ;;  %v238_v30 = vpop.xlane.xlu0 %237  ;;  %v363_v35 = vsub.f32 %v248_v22, %v275_v26  ;;  %v3253_v28 = vand.u32 4294901760, %v770_v19 }
  0xa6   : > { %v349_v31 = vsub.f32 %v246_v24, %v269_v27  ;;  %v247_v32 = vmul.f32 0.00390625, %v238_v30 }
  0xa7   : > { %v278_v33 = vand.u32 4294901760, %v249_v29  ;;  %v364_v43 = vand.u32 4294901760, %v363_v35 }
  0xa8   : > { %v350_v36 = vand.u32 4294901760, %v349_v31  ;;  %v272_v37 = vand.u32 4294901760, %v247_v32  ;;  %v3230_v14 = vpop.xlane.xlu1 %254 }
  0xa9   : > { %v370_v38 = vsub.f32 %v249_v29, %v278_v33  ;;  %v2906_v48 = vpack.c.bf16 %v278_v33, %v275_v26  ;;  %v365_v50 = vsub.f32 %v363_v35, %v364_v43  ;;  %v3235_v16 = vpop.xlane.xlu0 %251  ;;  %v1358_v22 = vand.u32 4294901760, %v3230_v14 }
  0xaa   : > { %v356_v39 = vsub.f32 %v247_v32, %v272_v37  ;;  %v2903_v40 = vpack.c.bf16 %v272_v37, %v269_v27  ;;  %v351_v44 = vsub.f32 %v349_v31, %v350_v36  ;;  %v1355_v23 = vand.u32 4294901760, %v3235_v16 }
  0xab   : > { %v371_v41 = vand.u32 4294901760, %v370_v38  ;;  %v366_v55 = vand.u32 4294901760, %v365_v50  ;;  %v2918_v58 = vpack.c.bf16 %v370_v38, %v363_v35  ;;  %v3249_v26 = vand.u32 4294901760, %v767_v18 }
  0xac   : > { %v357_v45 = vand.u32 4294901760, %v356_v39  ;;  %2904 = vmatpush3.bf16.msra.mxu0 %v2903_v40  ;;  %v352_v51 = vand.u32 4294901760, %v351_v44  ;;  %v2915_v57 = vpack.c.bf16 %v356_v39, %v349_v31  ;;  %v3247_v24 = vpop.xlane.xlu1 %260  ;;  %v773_v29 = vsel %vm762_vm2, %v757_v21, 0 }
  0xad   : > { %2905 = vmatprep.subr.bf16.mxu0 %v3085_v12  ;;  %v372_v46 = vsub.f32 %v370_v38, %v371_v41  ;;  %v2930_v60 = vpack.c.bf16 %v371_v41, %v364_v43  ;;  %v3251_v27 = vpop.xlane.xlu0 %257  ;;  %v3259_v30 = vsub.f32 %v3230_v14, %v1358_v22  ;;  %v3264_v31 = vsub.f32 %v3235_v16, %v1355_v23  ;;  %v3286_v41 = vld [vmem:[%s3467_s2] sm:$0x3] }
  0xae   : > { %v358_v47 = vsub.f32 %v356_v39, %v357_v45  ;;  %v2927_v59 = vpack.c.bf16 %v357_v45, %v350_v36  ;;  %v1364_v32 = vand.u32 4294901760, %v3247_v24  ;;  %v1361_v33 = vand.u32 4294901760, %v3251_v27 }
  0xaf   : > { %v373_v53 = vand.u32 4294901760, %v372_v46  ;;  %v3269_v35 = vsub.f32 %v767_v18, %v3249_v26  ;;  %v3271_v36 = vand.u32 4294901760, %v773_v29  ;;  %v3274_v37 = vsub.f32 %v770_v19, %v3253_v28 }
  0xb0   : > { %v359_v52 = vand.u32 4294901760, %v358_v47  ;;  %2907 = vmatpush3.bf16.msra.mxu0 %v2906_v48  ;;  %v1443_v38 = vand.u32 4294901760, %v3259_v30  ;;  %v1436_v39 = vand.u32 4294901760, %v3264_v31  ;;  %v3291_v42 = vsub.f32 %v3251_v27, %v1361_v33 }
  0xb1   : > { %2908 = vmatprep.subr.bf16.mxu0 %v3085_v12  ;;  %v2912_v56 = vpack.c.bf16 %v373_v53, %v366_v55  ;;  %v3294_v43 = vand.u32 4294901760, %v3269_v35  ;;  %v3297_v44 = vsub.f32 %v773_v29, %v3271_v36  ;;  %v3300_v45 = vand.u32 4294901760, %v3274_v37 }
  0xb2   : > { %v2909_v54 = vpack.c.bf16 %v359_v52, %v352_v51  ;;  %v1444_v47 = vsub.f32 %v3259_v30, %v1443_v38  ;;  %v1450_v53 = vand.u32 4294901760, %v3291_v42 }
  0xb3   : > { %2683 = vmatmul.mubr.f32.vlgmr.msra.gmra.mrb[0].mxu0 %v3184_v49  ;;  %v3314_v55 = vand.u32 4294901760, %v3297_v44 }
  0xb4   : > { %2910 = vmatpush3.bf16.msra.mxu0 %v2909_v54  ;;  %2693 = vmatprep.mubr.msk.f32.mxu0 %vm3086_vm0, %v3087_v13  ;;  %v858_v54 = vsub.f32 %v3269_v35, %v3294_v43  ;;  %v1451_v10 = vsub.f32 %v3291_v42, %v1450_v53 }
  0xb5   : > { %2911 = vmatprep.subr.bf16.mxu0 %v3085_v12  ;;  %v878_v17 = vsub.f32 %v3297_v44, %v3314_v55 }
  0xb6   : > { %v3325_v15 = vand.u32 4294901760, %v858_v54  ;;  %v1452_v29 = vand.u32 4294901760, %v1451_v10 }
  0xb8   : > { %2913 = vmatpush3.bf16.msra.mxu0 %v2912_v56 }
  0xb9   : > { %2914 = vmatprep.subr.bf16.mxu0 %v3085_v12 }
  0xbb   : > { %2694 = vmatmul.mubr.f32.vlgmr.msra.gmra.mrb[0].mxu0 %v3173_v20 }
  0xbc   : > { %2916 = vmatpush3.bf16.msra.mxu0 %v2915_v57  ;;  %2704 = vmatprep.mubr.msk.f32.mxu0 %vm3086_vm0, %v3087_v13  ;;  %v868_v57 = vsub.f32 %v3274_v37, %v3300_v45 }
  0xbd   : > { %2917 = vmatprep.subr.bf16.mxu0 %v3085_v12 }
  0xbe   : > { %v3329_v18 = vand.u32 4294901760, %v868_v57 }
  0xc0   : > { %2919 = vmatpush3.bf16.msra.mxu0 %v2918_v58  ;;  %v1445_v58 = vand.u32 4294901760, %v1444_v47  ;;  %v3333_v47 = vand.u32 4294901760, %v878_v17 }
  0xc1   : > { %2920 = vmatprep.subr.bf16.mxu0 %v3085_v12 }
  0xc3   : > { %2705 = vmatmul.mubr.f32.vlgmr.msra.gmra.mrb[0].mxu0 %v3176_v25 }
  0xc4   : > { %2922 = vmatpush3.bf16.msra.mxu0 %v2903_v40  ;;  %2715 = vmatprep.mubr.msk.f32.mxu0 %vm3086_vm0, %v3087_v13 }
  0xc5   : > { %2923 = vmatprep.subr.bf16.mxu0 %v3085_v12 }
  0xc8   : > { %2925 = vmatpush3.bf16.msra.mxu0 %v2906_v48 }
  0xc9   : > { %2926 = vmatprep.subr.bf16.mxu0 %v3085_v12 }
  0xcb   : > { %2716 = vmatmul.mubr.f32.vlgmr.msra.gmra.mrb[0].mxu0 %v3179_v34 }
  0xcc   : > { %2928 = vmatpush3.bf16.msra.mxu0 %v2927_v59  ;;  %2726 = vmatprep.mubr.msk.f32.mxu0 %vm3086_vm0, %v3087_v13 }
  0xcd   : > { %2929 = vmatprep.subr.bf16.mxu0 %v3085_v12 }
  0xd0   : > { %2931 = vmatpush3.bf16.msra.mxu0 %v2930_v60 }
  0xd1   : > { %2932 = vmatprep.subr.bf16.mxu0 %v3085_v12 }
  0xd3   : > { %2727 = vmatmul.mubr.f32.vlgmr.msra.gmra.mrb[0].mxu0 %v3173_v20 }
  0xd4   : > { %2934 = vmatpush3.bf16.msra.mxu0 %v2903_v40  ;;  %2737 = vmatprep.mubr.msk.f32.mxu0 %vm3086_vm0, %v3087_v13  ;;  %v3281_v40 = vsub.f32 %v3247_v24, %v1364_v32 }
  0xd5   : > { %2935 = vmatprep.subr.bf16.mxu0 %v3085_v12 }
  0xd6   : > { %v1457_v50 = vand.u32 4294901760, %v3281_v40  ;;  %v2954_v57 = vpack.c.bf16 %v3281_v40, %v3291_v42 }
  0xd8   : > { %2937 = vmatpush3.bf16.msra.mxu0 %v2906_v48  ;;  %v1437_v48 = vsub.f32 %v3264_v31, %v1436_v39  ;;  %v1458_v60 = vsub.f32 %v3281_v40, %v1457_v50  ;;  %v2966_v14 = vpack.c.bf16 %v1457_v50, %v1450_v53 }
  0xda   : > { %v1438_v59 = vand.u32 4294901760, %v1437_v48  ;;  %v1459_v21 = vand.u32 4294901760, %v1458_v60 }
  0xdb   : > { %2738 = vmatmul.mubr.f32.vlgmr.msra.gmra.mrb[0].mxu0 %v3173_v20 }
  0xdc   : > { %2742 = vmatprep.mubr.f32.mxu0 %v3227_v11 }
 0x1ae   : > { %v749_v46 = vpop.f32.mrb[0].mxu0 }
 0x1af   : > { %v2974_v51 = vadd.f32 %v749_v46, %v3286_v41  ;;  %v2739_v52 = vpop.f32.mrb[1].mxu0  ;;  %v2945_v46 = vpack.c.bf16 %v1445_v58, %v1438_v59  ;;  %v2939_v58 = vpack.c.bf16 %v1358_v22, %v1355_v23  ;;  %v2942_v59 = vpack.c.bf16 %v1364_v32, %v1361_v33 }
 0x1b0   : > { %v2948_v52 = vpack.c.bf16 %v1459_v21, %v1452_v29 }
 0x1b1   : > { %v753_v56 = vmax.f32 %v2974_v51, 0.0 }
 0x1b3   : > { %v777_v61 = vsel %vm775_vm3, %v753_v56, 0  ;;  %v2951_v56 = vpack.c.bf16 %v3259_v30, %v3264_v31 }
 0x1b4   : > { %v780_v62 = vand.u32 4294901760, %v777_v61 }
 0x1b6   : > { %v887_v19 = vsub.f32 %v777_v61, %v780_v62  ;;  %2740 = vmatprep.subr.mxu0 %v780_v62  ;;  %2780 = vmatprep.subr.mxu1 %v780_v62 }
 0x1b7   : > { %2741 = vmatpush3.msra.mxu0 %v780_v62  ;;  %2781 = vmatpush3.msra.mxu1 %v780_v62 }
 0x1b8   : > { %2743 = vmatmul.mubr.f32.vlgmr.msra.gmra.mrb[2].mxu0 %v3325_v15  ;;  %2783 = vmatmul.mubr.f32.vlgmr.msra.gmra.mrb[0].mxu1 %v3249_v26  ;;  %v888_v48 = vand.u32 4294901760, %v887_v19 }
 0x1b9   : > { %2944 = vmatprep.subr.bf16.mxu1 %v3085_v12  ;;  %2745 = vmatprep.mubr.f32.mxu0 %v3329_v18 }
 0x1ba   : > { %2946 = vmatpush3.bf16.msra.mxu1 %v2945_v46  ;;  %2785 = vmatprep.mubr.f32.mxu1 %v3253_v28  ;;  %v889_v51 = vsub.f32 %v887_v19, %v888_v48 }
 0x1bb   : > { %2947 = vmatprep.subr.bf16.mxu1 %v3085_v12 }
 0x1bc   : > { %2746 = vmatmul.mubr.f32.gmra.mrb[4].mxu0 %v3333_v47  ;;  %2786 = vmatmul.mubr.f32.gmra.mrb[2].mxu1 %v3271_v36  ;;  %v890_v54 = vand.u32 4294901760, %v889_v51 }
 0x1bd   : > { %2750 = vmatprep.mubr.f32.mxu0 %v3216_v63  ;;  %2807 = vmatprep.mubr.msk.f32.mxu1 %vm3086_vm0, %v3087_v13 }
 0x1be   : > { %2949 = vmatpush3.bf16.msra.mxu1 %v2948_v52  ;;  %2748 = vmatprep.subr.mxu0 %v890_v54 }
 0x1bf   : > { %2749 = vmatpush3.msra.mxu0 %v890_v54  ;;  %2950 = vmatprep.subr.bf16.mxu1 %v3085_v12 }
 0x1c0   : > { %2751 = vmatmul.mubr.f32.vlgmr.msra.gmra.mrb[2].mxu0 %v3249_v26  ;;  %2756 = vmatprep.subr.mxu0 %v887_v19 }
 0x1c1   : > { %2808 = vmatmul.mubr.f32.vlgmr.msra.gmra.mrb[4].mxu1 %v3173_v20  ;;  %2757 = vmatpush3.msra.mxu0 %v887_v19 }
 0x1c2   : > { %2952 = vmatpush3.bf16.msra.mxu1 %v2951_v56  ;;  %2764 = vmatprep.subr.mxu0 %v780_v62 }
 0x1c3   : > { %2753 = vmatprep.mubr.f32.mxu0 %v3253_v28  ;;  %2953 = vmatprep.subr.bf16.mxu1 %v3085_v12 }
 0x1c4   : > { %2754 = vmatmul.mubr.f32.gmra.mrb[4].mxu0 %v3271_v36  ;;  %2818 = vmatprep.mubr.msk.f32.mxu1 %vm3086_vm0, %v3087_v13 }
 0x1c5   : > { %2758 = vmatprep.mubr.f32.mxu0 %v3219_v3 }
 0x1c6   : > { %2955 = vmatpush3.bf16.msra.mxu1 %v2954_v57 }
 0x1c7   : > { %2956 = vmatprep.subr.bf16.mxu1 %v3085_v12 }
 0x1c8   : > { %2759 = vmatmul.mubr.f32.vlgmr.msra.gmra.mrb[2].mxu0 %v3269_v35 }
 0x1c9   : > { %2765 = vmatpush3.msra.mxu0 %v780_v62  ;;  %2819 = vmatmul.mubr.f32.vlgmr.msra.gmra.mrb[4].mxu1 %v3176_v25  ;;  %v2963_v25 = vpack.c.bf16 %v1443_v38, %v1436_v39 }
 0x1ca   : > { %2772 = vmatprep.subr.mxu0 %v888_v48  ;;  %2958 = vmatpush3.bf16.msra.mxu1 %v2939_v58 }
 0x1cb   : > { %2761 = vmatprep.mubr.f32.mxu0 %v3274_v37  ;;  %2959 = vmatprep.subr.bf16.mxu1 %v3085_v12 }
 0x1cc   : > { %2762 = vmatmul.mubr.f32.gmra.mrb[4].mxu0 %v3297_v44  ;;  %2829 = vmatprep.mubr.msk.f32.mxu1 %vm3086_vm0, %v3087_v13 }
 0x1cd   : > { %2766 = vmatprep.mubr.f32.mxu0 %v3223_v7 }
 0x1ce   : > { %2961 = vmatpush3.bf16.msra.mxu1 %v2942_v59 }
 0x1cf   : > { %2962 = vmatprep.subr.bf16.mxu1 %v3085_v12 }
 0x1d0   : > { %2767 = vmatmul.mubr.f32.vlgmr.msra.gmra.mrb[2].mxu0 %v3294_v43 }
 0x1d1   : > { %2773 = vmatpush3.msra.mxu0 %v888_v48  ;;  %2830 = vmatmul.mubr.f32.vlgmr.msra.gmra.mrb[4].mxu1 %v3179_v34 }
 0x1d2   : > { %2964 = vmatpush3.bf16.msra.mxu1 %v2963_v25  ;;  %2769 = vmatprep.mubr.f32.mxu0 %v3300_v45 }
 0x1d3   : > { %2965 = vmatprep.subr.bf16.mxu1 %v3085_v12  ;;  %2938 = vmatprep.subr.bf16.mxu0 %v3085_v12 }
 0x1d4   : > { %2770 = vmatmul.mubr.f32.gmra.mrb[4].mxu0 %v3314_v55  ;;  %2840 = vmatprep.mubr.msk.f32.mxu1 %vm3086_vm0, %v3087_v13 }
 0x1d5   : > { %2774 = vmatprep.mubr.f32.mxu0 %v3216_v63 }
 0x1d6   : > { %2967 = vmatpush3.bf16.msra.mxu1 %v2966_v14 }
 0x1d7   : > { %2968 = vmatprep.subr.bf16.mxu1 %v3085_v12 }
 0x1d8   : > { %2775 = vmatmul.mubr.f32.vlgmr.msra.gmra.mrb[2].mxu0 %v3249_v26 }
 0x1d9   : > { %2940 = vmatpush3.bf16.msra.mxu0 %v2939_v58  ;;  %2841 = vmatmul.mubr.f32.vlgmr.msra.gmra.mrb[4].mxu1 %v3173_v20 }
 0x1da   : > { %2970 = vmatpush3.bf16.msra.mxu1 %v2939_v58  ;;  %2777 = vmatprep.mubr.f32.mxu0 %v3253_v28 }
 0x1db   : > { %2941 = vmatprep.subr.bf16.mxu0 %v3085_v12  ;;  %2971 = vmatprep.subr.bf16.mxu1 %v3085_v12 }
 0x1dc   : > { %2778 = vmatmul.mubr.f32.gmra.mrb[4].mxu0 %v3271_v36  ;;  %2851 = vmatprep.mubr.msk.f32.mxu1 %vm3086_vm0, %v3087_v13 }
 0x1dd   : > { %2943 = vmatpush3.bf16.msra.mxu0 %v2942_v59  ;;  %2796 = vmatprep.mubr.msk.f32.mxu0 %vm3086_vm0, %v3087_v13 }
 0x1de   : > { %2973 = vmatpush3.bf16.msra.mxu1 %v2942_v59 }
 0x1e0   : > { %2797 = vmatmul.mubr.f32.vlgmr.msra.gmra.mrb[6].mxu0 %v3184_v49 }
 0x1e1   : > { %2852 = vmatmul.mubr.f32.vlgmr.msra.gmra.mrb[4].mxu1 %v3173_v20 }
 0x1e2   : > { %2856 = vmatprep.mubr.f32.mxu1 %v3227_v11 }
 0x2ab   : > { %v2776_v34 = vpop.f32.mrb[2].mxu0 }
 0x2ac   : > { %v1242_v16 = vpop.f32.mrb[3].mxu0 }
 0x2af   : > { %v3406_v22 = vpop.f32.mrb[4].mxu0 }
 0x2b0   : > { %v3408_v12 = vpop.f32.mrb[5].mxu0 }
 0x2b3   : > { %v1429_v23 = vpop.f32.mrb[6].mxu0 }
 0x2b4   : > { %v1430_v24 = vadd.f32 %v1429_v23, %v3286_v41  ;;  %v1835_v27 = vpop.f32.mrb[4].mxu1  ;;  %v2798_v30 = vpop.f32.mrb[7].mxu0 }
 0x2b5   : > { %v2853_v31 = vpop.f32.mrb[5].mxu1 }
 0x2b6   : > { %v2988_v13 = vadd.f32 %v1835_v27, %v1430_v24 }
 0x2b8   : > { %v1839_v32 = vmax.f32 %v2988_v13, 0.0 }
 0x2ba   : > { %v1841_v49 = vsel %vm775_vm3, %v1839_v32, 0 }
 0x2bb   : > { %v1844_v33 = vand.u32 4294901760, %v1841_v49 }
 0x2bd   : > { %v1951_v20 = vsub.f32 %v1841_v49, %v1844_v33  ;;  %2854 = vmatprep.subr.mxu1 %v1844_v33 }
 0x2be   : > { %2855 = vmatpush3.msra.mxu1 %v1844_v33 }
 0x2bf   : > { %2857 = vmatmul.mubr.f32.vlgmr.msra.gmra.mrb[0].mxu1 %v3325_v15  ;;  %v1952_v11 = vand.u32 4294901760, %v1951_v20 }
 0x2c0   : > { %2859 = vmatprep.mubr.f32.mxu1 %v3329_v18 }
 0x2c1   : > { %v1953_v38 = vsub.f32 %v1951_v20, %v1952_v11 }
 0x2c3   : > { %2860 = vmatmul.mubr.f32.gmra.mrb[2].mxu1 %v3333_v47  ;;  %v1954_v39 = vand.u32 4294901760, %v1953_v38 }
 0x2c4   : > { %2864 = vmatprep.mubr.f32.mxu1 %v3216_v63 }
 0x2c5   : > { %2862 = vmatprep.subr.mxu1 %v1954_v39 }
 0x2c6   : > { %2863 = vmatpush3.msra.mxu1 %v1954_v39 }
 0x2c7   : > { %2865 = vmatmul.mubr.f32.vlgmr.msra.gmra.mrb[0].mxu1 %v3249_v26  ;;  %2870 = vmatprep.subr.mxu1 %v1951_v20 }
 0x2c8   : > { %2871 = vmatpush3.msra.mxu1 %v1951_v20  ;;  %2867 = vmatprep.mubr.f32.mxu1 %v3253_v28 }
 0x2c9   : > { %2878 = vmatprep.subr.mxu1 %v1844_v33 }
 0x2cb   : > { %2868 = vmatmul.mubr.f32.gmra.mrb[2].mxu1 %v3271_v36 }
 0x2cc   : > { %2872 = vmatprep.mubr.f32.mxu1 %v3219_v3  ;;  %v3088_v3 = vmov 0  }
 0x2cd   : > { %3060 = vset.pattern.permute.xlu1 %v3088_v3  ;;  %3059 = vset.pattern.permute.xlu0 %v3088_v3 }
 0x2cf   : > { %2873 = vmatmul.mubr.f32.vlgmr.msra.gmra.mrb[0].mxu1 %v3269_v35  ;;  %v758_v35 = vld [vmem:[%s3469_s4] sm:$0xff] }
 0x2d0   : > { %2879 = vmatpush3.msra.mxu1 %v1844_v33  ;;  %2875 = vmatprep.mubr.f32.mxu1 %v3274_v37  ;;  %v2978_v40 = vadd.f32 %v758_v35, %v758_v35 }
 0x2d1   : > { %2886 = vmatprep.subr.mxu1 %v1952_v11 }
 0x2d2   : > { %v2979_v41 = vadd.f32 %v2978_v40, %v1242_v16 }
 0x2d3   : > { %2876 = vmatmul.mubr.f32.gmra.mrb[2].mxu1 %v3297_v44 }
 0x2d4   : > { %2880 = vmatprep.mubr.f32.mxu1 %v3223_v7  ;;  %v759_v7 = vld [vmem:[%s3469_s4 + $0x8] sm:$0xff] }
 0x2d5   : > { %v2975_v37 = vadd.f32 %v759_v7, %v759_v7 }
 0x2d7   : > { %2881 = vmatmul.mubr.f32.vlgmr.msra.gmra.mrb[0].mxu1 %v3294_v43 }
 0x2d8   : > { %2887 = vmatpush3.msra.mxu1 %v1952_v11  ;;  %2883 = vmatprep.mubr.f32.mxu1 %v3300_v45 }
 0x2d9   : > { %2894 = vmatprep.subr.mxu1 %v1844_v33 }
 0x2db   : > { %2884 = vmatmul.mubr.f32.gmra.mrb[2].mxu1 %v3314_v55 }
 0x2dc   : > { %2888 = vmatprep.mubr.f32.mxu1 %v3216_v63 }
 0x2df   : > { %2889 = vmatmul.mubr.f32.vlgmr.msra.gmra.mrb[0].mxu1 %v3249_v26 }
 0x2e0   : > { %2895 = vmatpush3.msra.mxu1 %v1844_v33  ;;  %2891 = vmatprep.mubr.f32.mxu1 %v3253_v28 }
 0x2e3   : > { %2892 = vmatmul.mubr.f32.gmra.mrb[2].mxu1 %v3271_v36 }
 0x2e4   : > { %2896 = vmatprep.mubr.f32.mxu1 %v3216_v63  ;;  %v761_v63 = vld [vmem:[%s3469_s4 + $0x18] sm:$0xff] }
 0x2e7   : > { %2897 = vmatmul.mubr.f32.vlgmr.msra.gmra.mrb[0].mxu1 %v3249_v26  ;;  %v760_v26 = vld [vmem:[%s3469_s4 + $0x10] sm:$0xff] }
 0x2e8   : > { %2899 = vmatprep.mubr.f32.mxu1 %v3253_v28  ;;  %v2976_v28 = vadd.f32 %v2975_v37, %v2776_v34  ;;  %v2984_v42 = vadd.f32 %v760_v26, %v760_v26 }
 0x2ea   : > { %v2985_v60 = vadd.f32 %v2984_v42, %v3408_v12 }
 0x2eb   : > { %2900 = vmatmul.mubr.f32.gmra.mrb[2].mxu1 %v3271_v36  ;;  %v2981_v36 = vadd.f32 %v761_v63, %v761_v63 }
 0x2ed   : > { %v2982_v53 = vadd.f32 %v2981_v36, %v3406_v22 }
 0x3ba   : > { %v2898_v43 = vpop.f32.mrb[0].mxu1 }
 0x3bb   : > { %v2977_v44 = vadd.f32 %v2976_v28, %v2898_v43  ;;  %v2396_v45 = vpop.f32.mrb[1].mxu1 }
 0x3bc   : > { %v2980_v50 = vadd.f32 %v2979_v41, %v2396_v45 }
 0x3bd   : > { %v2547_v55 = vmul.f32 -1.442695, %v2977_v44 }
 0x3be   : > { %v2546_v61 = vmul.f32 -1.442695, %v2980_v50  ;;  %v2901_v62 = vpop.f32.mrb[2].mxu1 }
 0x3bf   : > { %3061 = vpow2.f32 %v2547_v55  ;;  %v2983_v10 = vadd.f32 %v2982_v53, %v2901_v62  ;;  %v2408_v15 = vpop.f32.mrb[3].mxu1 }
 0x3c0   : > { %3063 = vpow2.f32 %v2546_v61  ;;  %v2986_v17 = vadd.f32 %v2985_v60, %v2408_v15 }
 0x3c1   : > { %v2549_v18 = vmul.f32 -1.442695, %v2983_v10 }
 0x3c2   : > { %v2548_v19 = vmul.f32 -1.442695, %v2986_v17 }
 0x3c3   : > { %3065 = vpow2.f32 %v2549_v18 }
 0x3c4   : > { %3067 = vpow2.f32 %v2548_v19 }
 0x3c9   : > { %v3062_v21 = vpop.eup %3061 }
 0x3ca   : > { %v3064_v29 = vpop.eup %3063  ;;  %v2435_v46 = vadd.f32 1.0, %v3062_v21 }
 0x3cb   : > { %v2434_v47 = vadd.f32 1.0, %v3064_v29 }
 0x3cc   : > { %3069 = vrcp.f32 %v2435_v46 }
 0x3cd   : > { %v3066_v48 = vpop.eup %3065  ;;  %3071 = vrcp.f32 %v2434_v47 }
 0x3ce   : > { %v3068_v51 = vpop.eup %3067  ;;  %v2437_v54 = vadd.f32 1.0, %v3066_v48 }
 0x3cf   : > { %v2436_v52 = vadd.f32 1.0, %v3068_v51 }
 0x3d1   : > { %3073 = vrcp.f32 %v2436_v52 }
 0x3d2   : > { %3075 = vrcp.f32 %v2437_v54 }
 0x3d6   : > { %v3070_v56 = vpop.eup %3069 }
 0x3d7   : > { %v3072_v57 = vpop.eup %3071  ;;  %2453 = vperm.xlu1 %3060, %v3070_v56  }
 0x3d8   : > { %2448 = vperm.xlu0 %3059, %v3072_v57  }
 0x3db   : > { %v3074_v58 = vpop.eup %3073 }
 0x3dc   : > { %2458 = vperm.xlu1 %3060, %v3074_v58   ;;  %v3076_v59 = vpop.eup %3075 }
 0x3e0   : > { %2463 = vperm.xlu1 %3060, %v3076_v59  }
 0x456   : > { %v2454_v25 = vpop.permute.xlu1 %2453 }
 0x457   : > { %v2468_v14 = vmul.f32 %v2454_v25, %v3151_v8  ;;  %v2469_v34 = vmul.f32 %v2454_v25, %v3153_v9  ;;  %v2449_v16 = vpop.permute.xlu0 %2448 }
 0x458   : > { %v2466_v22 = vmul.f32 %v2449_v16, %v3139_v2  ;;  %v2467_v12 = vmul.f32 %v2449_v16, %v3143_v4 }
 0x459   : > { %2476 = vst [vmem:[%s224_s24 + $0x10] sm:$0xff] %v2468_v14  ;;  %2477 = vst [vmem:[%s224_s24 + $0x18] sm:$0xff] %v2469_v34 }
 0x45a   : > { %2474 = vst [vmem:[%s224_s24] sm:$0xff] %v2466_v22  ;;  %2475 = vst [vmem:[%s224_s24 + $0x8] sm:$0xff] %v2467_v12 }
 0x45b   : > { %v2459_v23 = vpop.permute.xlu1 %2458 }
 0x45c   : > { %v2470_v24 = vmul.f32 %v2459_v23, %v3135_v0  ;;  %v2471_v27 = vmul.f32 %v2459_v23, %v3137_v1 }
 0x45e   : > { %2478 = vst [vmem:[%s224_s24 + $0x20] sm:$0xff] %v2470_v24  ;;  %2479 = vst [vmem:[%s224_s24 + $0x28] sm:$0xff] %v2471_v27 }
 0x45f   : > { %v2464_v30 = vpop.permute.xlu1 %2463 }
 0x460   : > { %v2472_v8 = vmul.f32 %v2464_v30, %v3145_v5  ;;  %v2473_v9 = vmul.f32 %v2464_v30, %v3147_v6 }
 0x462   : > { %2480 = vst [vmem:[%s224_s24 + $0x30] sm:$0xff] %v2472_v8  ;;  %2481 = vst [vmem:[%s224_s24 + $0x38] sm:$0xff] %v2473_v9 }
 0x463 PF: > { %s15_s18 = sadd.s32 1, %s3083_s18  }
 0x464   : > { %p12_p4 = scmp.ge.s32.totalorder %s15_s18, 4  }
 0x466   :  { %14 = sbr.rel (!%p12_p4) target bundleno = 1 (0x1), region = 70 }

</bundles_post_ra>
